<compile_context>
chip_gen: v7x
topology: tpu7x:2x2x1
jax: 0.10.0
libtpu: 0.0.40
codegen_flags: <defaults>
</compile_context>

<pallas_src>
import jax
import jax.numpy as jnp
from jax.experimental import pallas as pl
from jax.experimental.pallas import tpu as pltpu

_LANE = 128
_SUBLANE = 8
_SMALL_PROBLEM_BYTES = 1 << 20       # <= 1 MiB total -> single-block fast path
_WEIGHT_RESIDENT_BYTES = 6 << 20     # full weight kept as one VMEM block below this
_VMEM_LIMIT_BYTES = 32 << 20         # scoped VMEM cap; safe on v5e/v6e/v7x


def _round_up(x, m):
    return ((x + m - 1) // m) * m


# --------------------------------------------------------------------------
# Kernels
# --------------------------------------------------------------------------
def _single_block_kernel(x_ref, w_ref, b_ref, o_ref):
    # Whole problem in one VMEM block: no grid loop, no scratch accumulator.
    z = jnp.dot(x_ref[...], w_ref[...], preferred_element_type=jnp.float32)
    z = z + b_ref[...]
    # sigmoid(z) == 0.5 * tanh(0.5 * z) + 0.5   (tanh -> EUP slot)
    o_ref[...] = (0.5 * jnp.tanh(0.5 * z) + 0.5).astype(o_ref.dtype)


def _tiled_kernel(x_ref, w_ref, b_ref, o_ref, acc_ref):
    # x_ref: (TM, TK)  w_ref: (TK, TN)  b_ref: (1, TN)
    # o_ref: (TM, TN)  acc_ref: (TM, TN) f32 scratch accumulator
    k = pl.program_id(2)

    prod = jnp.dot(x_ref[...], w_ref[...], preferred_element_type=jnp.float32)

    @pl.when(k == 0)
    def _first():
        acc_ref[...] = prod            # direct write: no zero-fill pass

    @pl.when(k > 0)
    def _accumulate():
        acc_ref[...] += prod

    @pl.when(k == pl.num_programs(2) - 1)
    def _finalize():
        z = acc_ref[...] + b_ref[...]
        o_ref[...] = (0.5 * jnp.tanh(0.5 * z) + 0.5).astype(o_ref.dtype)


# --------------------------------------------------------------------------
# Parameter preprocessing (done once, outside the hot path)
# --------------------------------------------------------------------------
def _prepare_params(weight, bias, mxu_dtype, tn_max, tk_max):
    """weight: (N, K) as in nn.Linear; returns padded (K, N) weight + tiling."""
    N, K = weight.shape
    assert bias.shape == (N,)
    w_dtype = weight.dtype if mxu_dtype is None else mxu_dtype
    itemsize = jnp.dtype(w_dtype).itemsize

    Kp0 = _round_up(K, _LANE)
    Np0 = _round_up(N, _LANE)

    if (Kp0 <= tk_max and Np0 <= 2048
            and Kp0 * Np0 * itemsize <= _WEIGHT_RESIDENT_BYTES):
        # Whole padded weight is a single VMEM block: its BlockSpec index map
        # is then constant over the grid, so Pallas never re-DMAs it.
        tk, tn = Kp0, Np0
    else:
        tk = min(tk_max, Kp0)
        tn = min(tn_max, Np0)

    Kp = _round_up(K, tk)
    Np = _round_up(N, tn)

    w_t = jnp.pad(weight.T, ((0, Kp - K), (0, Np - N))).astype(w_dtype)
    b2 = jnp.pad(bias.astype(jnp.float32).reshape(1, N), ((0, 0), (0, Np - N)))
    return w_t, b2, tk, tn, K, N


# --------------------------------------------------------------------------
# Forward application
# --------------------------------------------------------------------------
def _perceptron_apply(x, w_t, b2, tk, tn, K, N, *, mxu_dtype, tm_max):
    B, Kx = x.shape
    if Kx != K:
        raise ValueError(f"x has {Kx} features, layer expects {K}")
    Kp, Np = w_t.shape
    out_dtype = x.dtype

    x_in = x if mxu_dtype is None else x.astype(mxu_dtype)
    if Kp != K:
        x_in = jnp.pad(x_in, ((0, 0), (0, Kp - K)))

    # ---- tiny-problem fast path: one block, no grid loop, no scratch ------
    footprint = (B * Kp + Kp * Np + B * Np) * 4
    if footprint <= _SMALL_PROBLEM_BYTES and tk == Kp and tn == Np:
        out = pl.pallas_call(
            _single_block_kernel,
            out_shape=jax.ShapeDtypeStruct((B, Np), out_dtype),
            grid=(1,),
            in_specs=[
                pl.BlockSpec((B, Kp), lambda i: (0, 0)),
                pl.BlockSpec((Kp, Np), lambda i: (0, 0)),
                pl.BlockSpec((1, Np), lambda i: (0, 0)),
            ],
            out_specs=pl.BlockSpec((B, Np), lambda i: (0, 0)),
        )(x_in, w_t, b2)
        return out[:, :N]

    # ---- tiled path -------------------------------------------------------
    # Batch tile: multiple of 8, capped, shrunk when padding waste is large.
    tm = _round_up(min(tm_max, _round_up(B, _SUBLANE)), _SUBLANE)
    while tm > _SUBLANE and (_round_up(B, tm) - B) > tm // 2:
        tm = _round_up(tm // 2, _SUBLANE)
    Bp = _round_up(B, tm)
    if Bp != B:
        x_in = jnp.pad(x_in, ((0, Bp - B), (0, 0)))

    grid_i = Bp // tm
    grid_j = Np // tn
    # v7x megacore: make sure the parallel portion of the grid has >= 2 blocks.
    if grid_i * grid_j < 2 and tn % (2 * _LANE) == 0:
        tn = tn // 2
        grid_j = Np // tn
    grid_k = Kp // tk
    grid = (grid_i, grid_j, grid_k)

    out = pl.pallas_call(
        _tiled_kernel,
        out_shape=jax.ShapeDtypeStruct((Bp, Np), out_dtype),
        grid_spec=pltpu.PrefetchScalarGridSpec(
            num_scalar_prefetch=0,
            grid=grid,
            in_specs=[
                # x tile: depends on (batch tile i, reduction tile k)
                pl.BlockSpec((tm, tk), lambda i, j, k: (i, k)),
                # W tile: index constant across i (and across the whole grid
                # in the weight-resident case) -> streamed from HBM once.
                pl.BlockSpec((tk, tn), lambda i, j, k: (k, j)),
                # bias tile: only depends on the output-column tile
                pl.BlockSpec((1, tn), lambda i, j, k: (0, j)),
            ],
            out_specs=pl.BlockSpec((tm, tn), lambda i, j, k: (i, j)),
            scratch_shapes=[pltpu.VMEM((tm, tn), jnp.float32)],
        ),
        compiler_params=pltpu.CompilerParams(
            dimension_semantics=("parallel", "parallel", "arbitrary"),
            vmem_limit_bytes=_VMEM_LIMIT_BYTES,
        ),
    )(x_in, w_t, b2)

    return out[:B, :N]


def make_perceptron_layer(weight, bias, *, mxu_dtype=jnp.bfloat16,
                          tm=512, tn=512, tk=None):
    """Preprocess nn.Linear params once; return a jitted apply(x) closure.

    mxu_dtype=jnp.bfloat16 (default) halves HBM traffic and doubles MXU
    throughput on v6e/v7x; pass mxu_dtype=None for exact f32 semantics.
    """
    if tk is None:
        tk = 2048 if mxu_dtype == jnp.bfloat16 else 1024
    params = _prepare_params(weight, bias, mxu_dtype, tn_max=tn, tk_max=tk)

    def apply(x):
        return _perceptron_apply(x, *params, mxu_dtype=mxu_dtype, tm_max=tm)

    return jax.jit(apply)


def perceptron_layer(x, weight, bias, *, mxu_dtype=jnp.bfloat16,
                     tm=512, tn=512, tk=None):
    """One-shot convenience wrapper: y = sigmoid(x @ weight.T + bias)."""
    if tk is None:
        tk = 2048 if mxu_dtype == jnp.bfloat16 else 1024
    params = _prepare_params(weight, bias, mxu_dtype, tn_max=tn, tk_max=tk)
    return _perceptron_apply(x, *params, mxu_dtype=mxu_dtype, tm_max=tm)


# --------------------------------------------------------------------------
# Demo / correctness check
# --------------------------------------------------------------------------
if __name__ == "__main__":
    def init_linear(key, n_in, n_out):
        kw, kb = jax.random.split(key)
        bound = 1.0 / (n_in ** 0.5)   # nn.Linear default init range
        w = jax.random.uniform(kw, (n_out, n_in), jnp.float32, -bound, bound)
        b = jax.random.uniform(kb, (n_out,), jnp.float32, -bound, bound)
        return w, b

    def reference(x, w, b):
        logits = jnp.dot(x, w.T, precision=jax.lax.Precision.HIGHEST) + b
        return jax.nn.sigmoid(logits)

    key = jax.random.PRNGKey(0)
    k1, k2, k3, k4 = jax.random.split(key, 4)

    # --- Test 1: the module's actual tiny shapes (single-block fast path) ---
    B1, K1, N1 = 8, 32, 16
    w1, b1 = init_linear(k1, K1, N1)
    x1 = jax.random.normal(k2, (B1, K1), jnp.float32)
    layer1 = make_perceptron_layer(w1, b1, mxu_dtype=None)   # exact f32
    out1 = jax.block_until_ready(layer1(x1))
    assert out1.shape == (B1, N1)
    assert jnp.allclose(out1, reference(x1, w1, b1), atol=1e-5, rtol=1e-5)

    # --- Test 2: tiled path with batch padding + weight-resident tiling -----
    B2, K2, N2 = 600, 384, 250
    w2, b2 = init_linear(k3, K2, N2)
    x2 = jax.random.normal(k4, (B2, K2), jnp.float32)
    layer2 = make_perceptron_layer(w2, b2, mxu_dtype=None)   # exact f32
    out2 = jax.block_until_ready(layer2(x2))
    assert out2.shape == (B2, N2)
    assert jnp.allclose(out2, reference(x2, w2, b2), atol=1e-4, rtol=1e-4)

    # --- Test 3: recommended bf16 MXU path (f32 accumulate + epilogue) ------
    layer3 = make_perceptron_layer(w2, b2)                   # default bf16
    out3 = jax.block_until_ready(layer3(x2))
    assert out3.shape == (B2, N2)
    assert jnp.allclose(out3, reference(x2, w2, b2), atol=2e-2, rtol=2e-2)

    print("KERNEL_OK")
</pallas_src>

<mosaic_0001>
module attributes {stable_mosaic.version = 11 : i64} {
  func.func @_single_block_kernel(%arg0: i32, %arg1: memref<8x128xf32, #tpu.memory_space<vmem>>, %arg2: memref<128x128xf32, #tpu.memory_space<vmem>>, %arg3: memref<1x128xf32, #tpu.memory_space<vmem>>, %arg4: memref<8x128xf32, #tpu.memory_space<vmem>>) attributes {dimension_semantics = [#tpu.dimension_semantics<arbitrary>], iteration_bounds = array<i64: 1>, scalar_prefetch = 0 : i64, scratch_operands = 0 : i64, tpu.core_type = #tpu.core_type<tc>, window_params = [{pipeline_mode = #tpu.pipeline_mode<synchronous>, transform_indices = @transform_0, window_bounds = array<i64: 8, 128>}, {pipeline_mode = #tpu.pipeline_mode<synchronous>, transform_indices = @transform_1, window_bounds = array<i64: 128, 128>}, {pipeline_mode = #tpu.pipeline_mode<synchronous>, transform_indices = @transform_2, window_bounds = array<i64: 1, 128>}, {pipeline_mode = #tpu.pipeline_mode<synchronous>, transform_indices = @transform_3, window_bounds = array<i64: 8, 128>}]} {
    %c0 = arith.constant 0 : index
    %c0_0 = arith.constant 0 : index
    %0 = vector.load %arg1[%c0, %c0_0] : memref<8x128xf32, #tpu.memory_space<vmem>>, vector<8x128xf32>
    %c0_1 = arith.constant 0 : index
    %c0_2 = arith.constant 0 : index
    %1 = vector.load %arg2[%c0_1, %c0_2] : memref<128x128xf32, #tpu.memory_space<vmem>>, vector<128x128xf32>
    %cst = arith.constant dense<0.000000e+00> : vector<8x128xf32>
    %2 = tpu.matmul %0, %1, %cst {dimension_numbers = #tpu.dot_dimension_numbers<[1], [0], [0], [1], [0, 0, 1, 1], [], []>} : vector<8x128xf32>, vector<128x128xf32>, vector<8x128xf32> -> vector<8x128xf32>
    %c0_3 = arith.constant 0 : index
    %c0_4 = arith.constant 0 : index
    %3 = vector.load %arg3[%c0_3, %c0_4] : memref<1x128xf32, #tpu.memory_space<vmem>>, vector<1x128xf32>
    %4 = vector.broadcast %3 : vector<1x128xf32> to vector<8x128xf32>
    %5 = arith.addf %2, %4 : vector<8x128xf32>
    %cst_5 = arith.constant 5.000000e-01 : f32
    %6 = vector.broadcast %cst_5 : f32 to vector<8x128xf32>
    %7 = arith.mulf %6, %5 : vector<8x128xf32>
    %8 = math.tanh %7 : vector<8x128xf32>
    %cst_6 = arith.constant 5.000000e-01 : f32
    %9 = vector.broadcast %cst_6 : f32 to vector<8x128xf32>
    %10 = arith.mulf %9, %8 : vector<8x128xf32>
    %cst_7 = arith.constant 5.000000e-01 : f32
    %11 = vector.broadcast %cst_7 : f32 to vector<8x128xf32>
    %12 = arith.addf %10, %11 : vector<8x128xf32>
    %c0_8 = arith.constant 0 : index
    %c0_9 = arith.constant 0 : index
    %13 = vector.load %arg4[%c0_8, %c0_9] : memref<8x128xf32, #tpu.memory_space<vmem>>, vector<8x128xf32>
    tpu.vector_store %arg4[%c0_8, %c0_9], %12 {strides = array<i32>} : memref<8x128xf32, #tpu.memory_space<vmem>>, vector<8x128xf32>,
    return
  }
  func.func @transform_0(%arg0: i32) -> (i32, i32) {
    %c0_i32 = arith.constant 0 : i32
    %c0_i32_0 = arith.constant 0 : i32
    %c0_i32_1 = arith.constant 0 : i32
    return %c0_i32, %c0_i32_0 : i32, i32
  }
  func.func @transform_1(%arg0: i32) -> (i32, i32) {
    %c0_i32 = arith.constant 0 : i32
    %c0_i32_0 = arith.constant 0 : i32
    %c0_i32_1 = arith.constant 0 : i32
    return %c0_i32, %c0_i32_0 : i32, i32
  }
  func.func @transform_2(%arg0: i32) -> (i32, i32) {
    %c0_i32 = arith.constant 0 : i32
    %c0_i32_0 = arith.constant 0 : i32
    %c0_i32_1 = arith.constant 0 : i32
    return %c0_i32, %c0_i32_0 : i32, i32
  }
  func.func @transform_3(%arg0: i32) -> (i32, i32) {
    %c0_i32 = arith.constant 0 : i32
    %c0_i32_0 = arith.constant 0 : i32
    %c0_i32_1 = arith.constant 0 : i32
    return %c0_i32, %c0_i32_0 : i32, i32
  }
}

</mosaic_0001>

<bundles_post_ra>
// kernel: apply.1
= control target key start
LH: loop header
LB: loop body
LE: loop exit
PB: predicated region body
PF: predicated region fallthrough
CT: control target
= control target key end

     0   :  { %8 = vsyncpa [#allocation3], 0  ;;  %s334_s0 = inlined_call_operand.vmem [shape: f32[8,128], index: 0, kind: input, shape index: {}]   ;;  %s335_s1 = inlined_call_operand.hbm [shape: f32[128,128], index: 1, kind: input, shape index: {}]   ;;  %s336_s2 = inlined_call_operand.vmem [shape: f32[1,128], index: 2, kind: input, shape index: {}]   ;;  %s337_s3 = inlined_call_operand.hbm [shape: f32[8,128], index: 3, kind: output, shape index: {}]  }
   0x1   :  { %9 = vsyncpa [#allocation4], 0  ;;  %s277_s12 = smov [#allocation2]   ;;  %s229_s16 = scalar_lea.hbm %s335_s1, 2048 }
   0x2   :  { %s17_s13 = sshll.u32 %s277_s12, 4  ;;  %p230_p0 = scmp.ne.s32.totalorder %s335_s1, %s229_s16  ;;  %s18_s13 = int_to_ptr.vmem [resolvable:$true] %s17_s13 }
   0x3   :  { %p233_p1 = scmp.lt.u32.totalorder %s229_s16, %s335_s1 }
   0x5   :  { %p235_p2 = pnand %p233_p1, %p230_p0 }
   0x7   :  { %238 = shalt.err (!%p235_p2)
}
   0x8   :  { %s239_s21 = scalar_lea.vmem %s18_s13, 2048  ;;  %p244_p4 = scmp.lt.s32.totalorder %s18_s13, %s18_s13 }
   0x9   :  { %p240_p3 = scmp.ne.s32.totalorder %s18_s13, %s239_s21  ;;  %p245_p5 = scmp.lt.s32.totalorder %s239_s21, %s239_s21 }
   0xb   :  { %p246_p6 = por %p245_p5, %p244_p4 }
   0xd   :  { %p247_p7 = pnand %p246_p6, %p240_p3 }
   0xf   :  { %250 = shalt.err (!%p247_p7)
}
  0x10   :  { %s278_s22 = smov 128   ;;  %s279_s23 = smov 8  }
  0x11   :  { %23 = dma.hbm_to_vmem [thread:$0]  %s335_s1, 2048, %s18_s13, [#allocation3], %s278_s22, %s278_s22, %s279_s23  }
  0x12   :  { %273 = dma.done.wait [#allocation3], 2048  }
  0x13   :  { %274 = vsyncadd [#allocation3], 4294965248  ;;  %v280_v0 = vmov 0.0|0.0   ;;  %vm281_vm0 = vmmov 0   ;;  %v282_v1 = vmov 0.0   ;;  %v30_v2 = vld [vmem:[#allocation2] sm:$0xff] }
  0x14   :  { %196 = vmatprep.subr.bf16.mxu0 %v280_v0  ;;  %193 = vmatprep.mubr.msk.f32.mxu0 %vm281_vm0, %v282_v1  ;;  %v31_v3 = vld [vmem:[#allocation2 + $0x8] sm:$0xff]  ;;  %v32_v4 = vld [vmem:[#allocation2 + $0x10] sm:$0xff]  ;;  %v33_v6 = vld [vmem:[#allocation2 + $0x18] sm:$0xff]  ;;  %s283_s29 = smov [#allocation5]  }
  0x15   :  { %v197_v5 = vpack.c.bf16 %v31_v3, %v30_v2  ;;  %v200_v7 = vpack.c.bf16 %v33_v6, %v32_v4  ;;  %v34_v8 = vld [vmem:[#allocation2 + $0x20] sm:$0xff]  ;;  %v35_v9 = vld [vmem:[#allocation2 + $0x28] sm:$0xff]  ;;  %v36_v11 = vld [vmem:[#allocation2 + $0x30] sm:$0xff]  ;;  %s134_s30 = sshll.u32 %s283_s29, 4  ;;  %s135_s30 = int_to_ptr.vmem [resolvable:$true] %s134_s30 }
  0x16   :  { %v203_v10 = vpack.c.bf16 %v35_v9, %v34_v8  ;;  %v37_v12 = vld [vmem:[#allocation2 + $0x38] sm:$0xff]  ;;  %v38_v14 = vld [vmem:[#allocation2 + $0x40] sm:$0xff]  ;;  %v39_v15 = vld [vmem:[#allocation2 + $0x48] sm:$0xff]  ;;  %s251_s4 = scalar_lea.vmem %s135_s30, 128  ;;  %p256_p9 = scmp.lt.s32.totalorder %s135_s30, %s135_s30 }
  0x17   :  { %198 = vmatpush3.bf16.msra.mxu0 %v197_v5  ;;  %v206_v13 = vpack.c.bf16 %v37_v12, %v36_v11  ;;  %v209_v16 = vpack.c.bf16 %v39_v15, %v38_v14  ;;  %v40_v17 = vld [vmem:[#allocation2 + $0x50] sm:$0xff]  ;;  %v41_v18 = vld [vmem:[#allocation2 + $0x58] sm:$0xff]  ;;  %v42_v20 = vld [vmem:[#allocation2 + $0x60] sm:$0xff]  ;;  %p252_p8 = scmp.ne.s32.totalorder %s135_s30, %s251_s4  ;;  %p257_p10 = scmp.lt.s32.totalorder %s251_s4, %s251_s4 }
  0x18   :  { %199 = vmatprep.subr.bf16.mxu0 %v280_v0  ;;  %v212_v19 = vpack.c.bf16 %v41_v18, %v40_v17  ;;  %v43_v21 = vld [vmem:[#allocation2 + $0x68] sm:$0xff]  ;;  %v44_v23 = vld [vmem:[#allocation2 + $0x70] sm:$0xff]  ;;  %v45_v24 = vld [vmem:[#allocation2 + $0x78] sm:$0xff] }
  0x19   :  { %v215_v22 = vpack.c.bf16 %v43_v21, %v42_v20  ;;  %v218_v25 = vpack.c.bf16 %v45_v24, %v44_v23  ;;  %v29_v26 = vld [vmem:[%s334_s0] sm:$0xff]  ;;  %p258_p11 = por %p257_p10, %p256_p9 }
  0x1a   :  { %v143_v27 = vld [vmem:[%s336_s2] ss:$0 sm:$0xff] }
  0x1b   :  { %201 = vmatpush3.bf16.msra.mxu0 %v200_v7  ;;  %p259_p12 = pnand %p258_p11, %p252_p8 }
  0x1c   :  { %202 = vmatprep.subr.bf16.mxu0 %v280_v0 }
  0x1f   :  { %204 = vmatpush3.bf16.msra.mxu0 %v203_v10 }
  0x20   :  { %205 = vmatprep.subr.bf16.mxu0 %v280_v0 }
  0x23   :  { %207 = vmatpush3.bf16.msra.mxu0 %v206_v13 }
  0x24   :  { %208 = vmatprep.subr.bf16.mxu0 %v280_v0 }
  0x27   :  { %210 = vmatpush3.bf16.msra.mxu0 %v209_v16 }
  0x28   :  { %211 = vmatprep.subr.bf16.mxu0 %v280_v0 }
  0x2b   :  { %213 = vmatpush3.bf16.msra.mxu0 %v212_v19 }
  0x2c   :  { %214 = vmatprep.subr.bf16.mxu0 %v280_v0 }
  0x2f   :  { %216 = vmatpush3.bf16.msra.mxu0 %v215_v22 }
  0x30   :  { %217 = vmatprep.subr.bf16.mxu0 %v280_v0 }
  0x33   :  { %219 = vmatpush3.bf16.msra.mxu0 %v218_v25 }
  0x36   :  { %194 = vmatmul.mubr.f32.vlgmr.msra.gmra.mrb[0].mxu0 %v29_v26 }
 0x109   :  { %v119_v28 = vpop.f32.mrb[0].mxu0 }
 0x10a   :  { %v120_v29 = vadd.f32 %v143_v27, %v119_v28  ;;  %v195_v30 = vpop.f32.mrb[1].mxu0 }
 0x10c   :  { %v123_v31 = vmul.f32 0.5, %v120_v29 }
 0x10e   :  { %227 = vtanh.f32 %v123_v31 }
 0x118   :  { %v228_v32 = vpop.eup %227 }
 0x119   :  { %v125_v33 = vmul.f32 0.5, %v228_v32 }
 0x11b   :  { %v126_v34 = vadd.f32 0.5, %v125_v33 }
 0x11d   :  { %127 = vst [vmem:[#allocation5] sm:$0xff] %v126_v34 }
 0x11e   :  { %262 = shalt.err (!%p259_p12)
}
 0x11f   :  { %s263_s5 = scalar_lea.hbm %s337_s3, 128 }
 0x120   :  { %p264_p13 = scmp.ne.s32.totalorder %s337_s3, %s263_s5  ;;  %p267_p0 = scmp.lt.u32.totalorder %s263_s5, %s337_s3 }
 0x122   :  { %p269_p1 = pnand %p267_p0, %p264_p13 }
 0x124   :  { %272 = shalt.err (!%p269_p1)
}
 0x125   :  { %137 = dma.vmem_to_hbm [thread:$0]  %s135_s30, 128, %s337_s3, [#allocation4]  }
 0x126   :  { %275 = dma.done.wait [#allocation4], 128  }
 0x127   :  { %276 = vsyncadd [#allocation4], 4294967168 }
 0x128   :  { %141 = vsyncpa [#allocation3], 1 }
 0x129   :  { %142 = vsyncpa [#allocation4], 1 }

</bundles_post_ra>
